<compile_context>
chip_gen: v7x
topology: tpu7x:2x2x1
jax: 0.10.0
libtpu: 0.0.40
codegen_flags: <defaults>
</compile_context>

<pallas_src>
import functools
import math

import jax
import jax.numpy as jnp
from jax import lax
from jax.experimental import pallas as pl
from jax.experimental.pallas import tpu as pltpu


def _mca_kernel(x_ref, wqkv_ref, bqkv_ref, wp_ref, bp_ref, o_ref, *,
                n_heads, seq_len, compute_dtype):
    """One grid step = a block of Bb batch elements, rows pre-flattened to (Bb*T, C)."""
    R, C = x_ref.shape                     # R = Bb * T
    T = seq_len
    Bb = R // T
    D = C // n_heads
    scale = 1.0 / math.sqrt(D)
    cd = compute_dtype

    x = x_ref[...].astype(cd)              # (Bb*T, C)

    # Fused QKV projection: single MXU pass with N = 3C, f32 accumulation.
    qkv = (jnp.dot(x, wqkv_ref[...].astype(cd),
                   preferred_element_type=jnp.float32)
           + bqkv_ref[...])                # (Bb*T, 3C) f32

    q = (qkv[:, :C] * scale).astype(cd)    # fold 1/sqrt(D) into q once
    k = qkv[:, C:2 * C].astype(cd)
    v = qkv[:, 2 * C:].astype(cd)

    wp = wp_ref[...].astype(cd)            # (C, C)
    bp = bp_ref[...]                       # (1, C) f32

    # Causal mask, equivalent to torch.tril(ones(max_T, max_T))[:T, :T].
    row = lax.broadcasted_iota(jnp.int32, (T, T), 0)
    col = lax.broadcasted_iota(jnp.int32, (T, T), 1)
    causal = row >= col
    neg_big = jnp.float32(-1e30)           # finite -> no NaN if a row is fully masked

    contract_last = (((1,), (1,)), ((), ()))   # q (T,D) . k (T,D) -> (T,T), no .T

    for b in range(Bb):                    # static python loop (small block)
        r0 = b * T
        acc = jnp.zeros((T, C), jnp.float32)
        for h in range(n_heads):           # static
            c0 = h * D
            qh = q[r0:r0 + T, c0:c0 + D]
            kh = k[r0:r0 + T, c0:c0 + D]
            vh = v[r0:r0 + T, c0:c0 + D]

            s = lax.dot_general(qh, kh, contract_last,
                                preferred_element_type=jnp.float32)     # (T, T)
            s = jnp.where(causal, s, neg_big)

            # Numerically-stable softmax, kept in f32.
            m = jnp.max(s, axis=-1, keepdims=True)
            p = jnp.exp(s - m)
            p = p * pl.reciprocal(jnp.sum(p, axis=-1, keepdims=True), approx=True)

            ah = jnp.dot(p.astype(cd), vh,
                         preferred_element_type=jnp.float32)            # (T, D)
            # Fold head h directly into the output projection (no concat).
            acc = acc + jnp.dot(ah.astype(cd), wp[c0:c0 + D, :],
                                preferred_element_type=jnp.float32)

        o_ref[r0:r0 + T, :] = (acc + bp).astype(o_ref.dtype)


def _default_block_b(B, T):
    """How many batch elements to fuse per grid step.

    Targets ~128 flattened rows per step (fills MXU sublanes, amortizes the
    ~0.35us per-grid-step overhead), constrained to a divisor of B so the
    BlockSpec tiles evenly."""
    target = max(1, 128 // max(T, 1))
    bb = min(B, target)
    while bb > 1 and B % bb:
        bb -= 1
    return max(bb, 1)


def masked_causal_attention(x, params, n_heads, *, max_T=None, block_b=None,
                            compute_dtype=jnp.float32):
    """x: (B, T, C) float32.  params: wq/wk/wv/wp of shape (C, C) (transposed vs
    torch so y = x @ W + b) and bq/bk/bv/bp of shape (1, C).

    compute_dtype: use jnp.bfloat16 on v6e/v7x at realistic sizes for the MXU
    inputs (f32 accumulation is kept); f32 default for exactness at toy sizes."""
    B, T, C = x.shape
    assert C % n_heads == 0
    if max_T is not None:
        assert T <= max_T, "sequence longer than the module's causal-mask buffer"

    # Fuse q/k/v weights and biases -> one matmul, two weight/bias streams total.
    wqkv = jnp.concatenate([params["wq"], params["wk"], params["wv"]], axis=1)
    bqkv = jnp.concatenate([params["bq"], params["bk"], params["bv"]], axis=1)
    wp, bp = params["wp"], params["bp"]

    if block_b is None:
        block_b = _default_block_b(B, T)
    assert B % block_b == 0
    grid_b = B // block_b
    rows = block_b * T

    # Flatten batch*seq outside the kernel: lane-dense 2D slabs in/out.
    x2 = x.reshape(B * T, C)

    grid_spec = pltpu.PrefetchScalarGridSpec(
        num_scalar_prefetch=0,
        grid=(grid_b,),
        in_specs=[
            pl.BlockSpec((rows, C), lambda b: (b, 0)),        # x rows block
            pl.BlockSpec((C, 3 * C), lambda b: (0, 0)),       # fused Wqkv
            pl.BlockSpec((1, 3 * C), lambda b: (0, 0)),       # fused bqkv
            pl.BlockSpec((C, C), lambda b: (0, 0)),           # Wproj
            pl.BlockSpec((1, C), lambda b: (0, 0)),           # bproj
        ],
        out_specs=pl.BlockSpec((rows, C), lambda b: (b, 0)),
    )

    out2 = pl.pallas_call(
        functools.partial(_mca_kernel, n_heads=n_heads, seq_len=T,
                          compute_dtype=compute_dtype),
        out_shape=jax.ShapeDtypeStruct((B * T, C), x.dtype),
        grid_spec=grid_spec,
        compiler_params=pltpu.CompilerParams(
            dimension_semantics=("parallel",)),
    )(x2, wqkv, bqkv, wp, bp)
    return out2.reshape(B, T, C)


def _init_linear(key, in_dim, out_dim):
    """Deterministic init mimicking nn.Linear default (uniform +/- 1/sqrt(fan_in)).

    Returns W of shape (in_dim, out_dim) so y = x @ W + b equals torch's
    x @ weight.T + bias."""
    k_w, k_b = jax.random.split(key)
    bound = 1.0 / math.sqrt(in_dim)
    w = jax.random.uniform(k_w, (in_dim, out_dim), jnp.float32, -bound, bound)
    b = jax.random.uniform(k_b, (1, out_dim), jnp.float32, -bound, bound)
    return w, b


def _reference_jax(x, params, n_heads):
    """Pure-JAX reference mirroring the PyTorch forward (eval mode)."""
    B, T, C = x.shape
    D = C // n_heads
    q = x @ params["wq"] + params["bq"]
    k = x @ params["wk"] + params["bk"]
    v = x @ params["wv"] + params["bv"]
    q = q.reshape(B, T, n_heads, D).transpose(0, 2, 1, 3)
    k = k.reshape(B, T, n_heads, D).transpose(0, 2, 1, 3)
    v = v.reshape(B, T, n_heads, D).transpose(0, 2, 1, 3)
    w = jnp.einsum("bntd,bnsd->bnts", q, k) / math.sqrt(D)
    mask = jnp.tril(jnp.ones((T, T), dtype=bool))
    w = jnp.where(mask[None, None], w, -jnp.inf)
    w = jax.nn.softmax(w, axis=-1)
    att = jnp.einsum("bnts,bnsd->bntd", w, v)
    att = att.transpose(0, 2, 1, 3).reshape(B, T, C)
    return att @ params["wp"] + params["bp"]


if __name__ == "__main__":
    # Small shapes consistent with the module: h_dim=32, n_heads=4, T=8, max_T>=T.
    B, T, C = 2, 8, 32
    n_heads, max_T = 4, 16

    key = jax.random.PRNGKey(0)
    kx, kq, kk, kv, kp = jax.random.split(key, 5)

    x = jax.random.normal(kx, (B, T, C), jnp.float32)

    wq, bq = _init_linear(kq, C, C)
    wk, bk = _init_linear(kk, C, C)
    wv, bv = _init_linear(kv, C, C)
    wp, bp = _init_linear(kp, C, C)
    params = dict(wq=wq, bq=bq, wk=wk, bk=bk, wv=wv, bv=bv, wp=wp, bp=bp)

    out = masked_causal_attention(x, params, n_heads, max_T=max_T)
    out = jax.block_until_ready(out)

    ref = _reference_jax(x, params, n_heads)
    assert out.shape == (B, T, C)
    # Tolerance allows for the EUP approximate reciprocal in the softmax.
    assert jnp.allclose(out, ref, atol=2e-3, rtol=2e-3), "mismatch vs reference"

    print("KERNEL_OK")
</pallas_src>

<mosaic_0001>
module attributes {stable_mosaic.version = 11 : i64} {
  func.func @_mca_kernel(%arg0: i32, %arg1: memref<16x32xf32, #tpu.memory_space<vmem>>, %arg2: memref<32x96xf32, #tpu.memory_space<vmem>>, %arg3: memref<1x96xf32, #tpu.memory_space<vmem>>, %arg4: memref<32x32xf32, #tpu.memory_space<vmem>>, %arg5: memref<1x32xf32, #tpu.memory_space<vmem>>, %arg6: memref<16x32xf32, #tpu.memory_space<vmem>>) attributes {dimension_semantics = [#tpu.dimension_semantics<parallel>], iteration_bounds = array<i64: 1>, scalar_prefetch = 0 : i64, scratch_operands = 0 : i64, tpu.core_type = #tpu.core_type<tc>, window_params = [{transform_indices = @transform_0, window_bounds = array<i64: 16, 32>}, {pipeline_mode = #tpu.pipeline_mode<synchronous>, transform_indices = @transform_1, window_bounds = array<i64: 32, 96>}, {pipeline_mode = #tpu.pipeline_mode<synchronous>, transform_indices = @transform_2, window_bounds = array<i64: 1, 96>}, {pipeline_mode = #tpu.pipeline_mode<synchronous>, transform_indices = @transform_3, window_bounds = array<i64: 32, 32>}, {pipeline_mode = #tpu.pipeline_mode<synchronous>, transform_indices = @transform_4, window_bounds = array<i64: 1, 32>}, {transform_indices = @transform_5, window_bounds = array<i64: 16, 32>}]} {
    %c0 = arith.constant 0 : index
    %c0_0 = arith.constant 0 : index
    %0 = vector.load %arg1[%c0, %c0_0] : memref<16x32xf32, #tpu.memory_space<vmem>>, vector<16x32xf32>
    %c0_1 = arith.constant 0 : index
    %c0_2 = arith.constant 0 : index
    %1 = vector.load %arg2[%c0_1, %c0_2] : memref<32x96xf32, #tpu.memory_space<vmem>>, vector<32x96xf32>
    %cst = arith.constant dense<0.000000e+00> : vector<16x96xf32>
    %2 = tpu.matmul %0, %1, %cst {dimension_numbers = #tpu.dot_dimension_numbers<[1], [0], [0], [1], [0, 0, 1, 1], [], []>} : vector<16x32xf32>, vector<32x96xf32>, vector<16x96xf32> -> vector<16x96xf32>
    %c0_3 = arith.constant 0 : index
    %c0_4 = arith.constant 0 : index
    %3 = vector.load %arg3[%c0_3, %c0_4] : memref<1x96xf32, #tpu.memory_space<vmem>>, vector<1x96xf32>
    %4 = vector.broadcast %3 : vector<1x96xf32> to vector<16x96xf32>
    %5 = arith.addf %2, %4 : vector<16x96xf32>
    %6 = vector.extract_strided_slice %5 {offsets = [0, 0], sizes = [16, 32], strides = [1, 1]} : vector<16x96xf32> to vector<16x32xf32>
    %cst_5 = arith.constant 0.353553385 : f32
    %7 = vector.broadcast %cst_5 : f32 to vector<16x32xf32>
    %8 = arith.mulf %6, %7 : vector<16x32xf32>
    %9 = vector.extract_strided_slice %5 {offsets = [0, 32], sizes = [16, 32], strides = [1, 1]} : vector<16x96xf32> to vector<16x32xf32>
    %10 = vector.extract_strided_slice %5 {offsets = [0, 64], sizes = [16, 32], strides = [1, 1]} : vector<16x96xf32> to vector<16x32xf32>
    %c0_6 = arith.constant 0 : index
    %c0_7 = arith.constant 0 : index
    %11 = vector.load %arg4[%c0_6, %c0_7] : memref<32x32xf32, #tpu.memory_space<vmem>>, vector<32x32xf32>
    %c0_8 = arith.constant 0 : index
    %c0_9 = arith.constant 0 : index
    %12 = vector.load %arg5[%c0_8, %c0_9] : memref<1x32xf32, #tpu.memory_space<vmem>>, vector<1x32xf32>
    %13 = tpu.iota {dimensions = array<i32: 0>} : vector<8x8xi32>
    %14 = tpu.iota {dimensions = array<i32: 1>} : vector<8x8xi32>
    %15 = arith.cmpi sge, %13, %14 : vector<8x8xi32>
    %cst_10 = arith.constant 0.000000e+00 : f32
    %16 = vector.broadcast %cst_10 : f32 to vector<8x32xf32>
    %17 = vector.extract_strided_slice %8 {offsets = [0, 0], sizes = [8, 8], strides = [1, 1]} : vector<16x32xf32> to vector<8x8xf32>
    %18 = vector.extract_strided_slice %9 {offsets = [0, 0], sizes = [8, 8], strides = [1, 1]} : vector<16x32xf32> to vector<8x8xf32>
    %19 = vector.extract_strided_slice %10 {offsets = [0, 0], sizes = [8, 8], strides = [1, 1]} : vector<16x32xf32> to vector<8x8xf32>
    %cst_11 = arith.constant dense<0.000000e+00> : vector<8x8xf32>
    %20 = tpu.matmul %17, %18, %cst_11 {dimension_numbers = #tpu.dot_dimension_numbers<[1], [1], [0], [0], [0, 0, 1, 0], [], []>} : vector<8x8xf32>, vector<8x8xf32>, vector<8x8xf32> -> vector<8x8xf32>
    %cst_12 = arith.constant -1.000000e+30 : f32
    %21 = vector.broadcast %cst_12 : f32 to vector<8x8xf32>
    %22 = arith.select %15, %20, %21 : vector<8x8xi1>, vector<8x8xf32>
    %cst_13 = arith.constant dense<0xFF800000> : vector<8xf32>
    %23 = vector.multi_reduction <maximumf>, %22, %cst_13 [1] : vector<8x8xf32> to vector<8xf32>
    %24 = vector.shape_cast %23 : vector<8xf32> to vector<8x1xf32>
    %25 = vector.broadcast %24 : vector<8x1xf32> to vector<8x8xf32>
    %26 = arith.subf %22, %25 : vector<8x8xf32>
    %27 = math.exp %26 : vector<8x8xf32>
    %cst_14 = arith.constant dense<0.000000e+00> : vector<8xf32>
    %28 = vector.multi_reduction <add>, %27, %cst_14 [1] : vector<8x8xf32> to vector<8xf32>
    %29 = vector.shape_cast %28 : vector<8xf32> to vector<8x1xf32>
    %30 = tpu.reciprocal %29 {approx = true} : vector<8x1xf32> -> vector<8x1xf32>
    %31 = vector.broadcast %30 : vector<8x1xf32> to vector<8x8xf32>
    %32 = arith.mulf %27, %31 : vector<8x8xf32>
    %cst_15 = arith.constant dense<0.000000e+00> : vector<8x8xf32>
    %33 = tpu.matmul %32, %19, %cst_15 {dimension_numbers = #tpu.dot_dimension_numbers<[1], [0], [0], [1], [0, 0, 1, 1], [], []>} : vector<8x8xf32>, vector<8x8xf32>, vector<8x8xf32> -> vector<8x8xf32>
    %34 = vector.extract_strided_slice %11 {offsets = [0, 0], sizes = [8, 32], strides = [1, 1]} : vector<32x32xf32> to vector<8x32xf32>
    %cst_16 = arith.constant dense<0.000000e+00> : vector<8x32xf32>
    %35 = tpu.matmul %33, %34, %cst_16 {dimension_numbers = #tpu.dot_dimension_numbers<[1], [0], [0], [1], [0, 0, 1, 1], [], []>} : vector<8x8xf32>, vector<8x32xf32>, vector<8x32xf32> -> vector<8x32xf32>
    %36 = arith.addf %16, %35 : vector<8x32xf32>
    %37 = vector.extract_strided_slice %8 {offsets = [0, 8], sizes = [8, 8], strides = [1, 1]} : vector<16x32xf32> to vector<8x8xf32>
    %38 = vector.extract_strided_slice %9 {offsets = [0, 8], sizes = [8, 8], strides = [1, 1]} : vector<16x32xf32> to vector<8x8xf32>
    %39 = vector.extract_strided_slice %10 {offsets = [0, 8], sizes = [8, 8], strides = [1, 1]} : vector<16x32xf32> to vector<8x8xf32>
    %cst_17 = arith.constant dense<0.000000e+00> : vector<8x8xf32>
    %40 = tpu.matmul %37, %38, %cst_17 {dimension_numbers = #tpu.dot_dimension_numbers<[1], [1], [0], [0], [0, 0, 1, 0], [], []>} : vector<8x8xf32>, vector<8x8xf32>, vector<8x8xf32> -> vector<8x8xf32>
    %cst_18 = arith.constant -1.000000e+30 : f32
    %41 = vector.broadcast %cst_18 : f32 to vector<8x8xf32>
    %42 = arith.select %15, %40, %41 : vector<8x8xi1>, vector<8x8xf32>
    %cst_19 = arith.constant dense<0xFF800000> : vector<8xf32>
    %43 = vector.multi_reduction <maximumf>, %42, %cst_19 [1] : vector<8x8xf32> to vector<8xf32>
    %44 = vector.shape_cast %43 : vector<8xf32> to vector<8x1xf32>
    %45 = vector.broadcast %44 : vector<8x1xf32> to vector<8x8xf32>
    %46 = arith.subf %42, %45 : vector<8x8xf32>
    %47 = math.exp %46 : vector<8x8xf32>
    %cst_20 = arith.constant dense<0.000000e+00> : vector<8xf32>
    %48 = vector.multi_reduction <add>, %47, %cst_20 [1] : vector<8x8xf32> to vector<8xf32>
    %49 = vector.shape_cast %48 : vector<8xf32> to vector<8x1xf32>
    %50 = tpu.reciprocal %49 {approx = true} : vector<8x1xf32> -> vector<8x1xf32>
    %51 = vector.broadcast %50 : vector<8x1xf32> to vector<8x8xf32>
    %52 = arith.mulf %47, %51 : vector<8x8xf32>
    %cst_21 = arith.constant dense<0.000000e+00> : vector<8x8xf32>
    %53 = tpu.matmul %52, %39, %cst_21 {dimension_numbers = #tpu.dot_dimension_numbers<[1], [0], [0], [1], [0, 0, 1, 1], [], []>} : vector<8x8xf32>, vector<8x8xf32>, vector<8x8xf32> -> vector<8x8xf32>
    %54 = vector.extract_strided_slice %11 {offsets = [8, 0], sizes = [8, 32], strides = [1, 1]} : vector<32x32xf32> to vector<8x32xf32>
    %cst_22 = arith.constant dense<0.000000e+00> : vector<8x32xf32>
    %55 = tpu.matmul %53, %54, %cst_22 {dimension_numbers = #tpu.dot_dimension_numbers<[1], [0], [0], [1], [0, 0, 1, 1], [], []>} : vector<8x8xf32>, vector<8x32xf32>, vector<8x32xf32> -> vector<8x32xf32>
    %56 = arith.addf %36, %55 : vector<8x32xf32>
    %57 = vector.extract_strided_slice %8 {offsets = [0, 16], sizes = [8, 8], strides = [1, 1]} : vector<16x32xf32> to vector<8x8xf32>
    %58 = vector.extract_strided_slice %9 {offsets = [0, 16], sizes = [8, 8], strides = [1, 1]} : vector<16x32xf32> to vector<8x8xf32>
    %59 = vector.extract_strided_slice %10 {offsets = [0, 16], sizes = [8, 8], strides = [1, 1]} : vector<16x32xf32> to vector<8x8xf32>
    %cst_23 = arith.constant dense<0.000000e+00> : vector<8x8xf32>
    %60 = tpu.matmul %57, %58, %cst_23 {dimension_numbers = #tpu.dot_dimension_numbers<[1], [1], [0], [0], [0, 0, 1, 0], [], []>} : vector<8x8xf32>, vector<8x8xf32>, vector<8x8xf32> -> vector<8x8xf32>
    %cst_24 = arith.constant -1.000000e+30 : f32
    %61 = vector.broadcast %cst_24 : f32 to vector<8x8xf32>
    %62 = arith.select %15, %60, %61 : vector<8x8xi1>, vector<8x8xf32>
    %cst_25 = arith.constant dense<0xFF800000> : vector<8xf32>
    %63 = vector.multi_reduction <maximumf>, %62, %cst_25 [1] : vector<8x8xf32> to vector<8xf32>
    %64 = vector.shape_cast %63 : vector<8xf32> to vector<8x1xf32>
    %65 = vector.broadcast %64 : vector<8x1xf32> to vector<8x8xf32>
    %66 = arith.subf %62, %65 : vector<8x8xf32>
    %67 = math.exp %66 : vector<8x8xf32>
    %cst_26 = arith.constant dense<0.000000e+00> : vector<8xf32>
    %68 = vector.multi_reduction <add>, %67, %cst_26 [1] : vector<8x8xf32> to vector<8xf32>
    %69 = vector.shape_cast %68 : vector<8xf32> to vector<8x1xf32>
    %70 = tpu.reciprocal %69 {approx = true} : vector<8x1xf32> -> vector<8x1xf32>
    %71 = vector.broadcast %70 : vector<8x1xf32> to vector<8x8xf32>
    %72 = arith.mulf %67, %71 : vector<8x8xf32>
    %cst_27 = arith.constant dense<0.000000e+00> : vector<8x8xf32>
    %73 = tpu.matmul %72, %59, %cst_27 {dimension_numbers = #tpu.dot_dimension_numbers<[1], [0], [0], [1], [0, 0, 1, 1], [], []>} : vector<8x8xf32>, vector<8x8xf32>, vector<8x8xf32> -> vector<8x8xf32>
    %74 = vector.extract_strided_slice %11 {offsets = [16, 0], sizes = [8, 32], strides = [1, 1]} : vector<32x32xf32> to vector<8x32xf32>
    %cst_28 = arith.constant dense<0.000000e+00> : vector<8x32xf32>
    %75 = tpu.matmul %73, %74, %cst_28 {dimension_numbers = #tpu.dot_dimension_numbers<[1], [0], [0], [1], [0, 0, 1, 1], [], []>} : vector<8x8xf32>, vector<8x32xf32>, vector<8x32xf32> -> vector<8x32xf32>
    %76 = arith.addf %56, %75 : vector<8x32xf32>
    %77 = vector.extract_strided_slice %8 {offsets = [0, 24], sizes = [8, 8], strides = [1, 1]} : vector<16x32xf32> to vector<8x8xf32>
    %78 = vector.extract_strided_slice %9 {offsets = [0, 24], sizes = [8, 8], strides = [1, 1]} : vector<16x32xf32> to vector<8x8xf32>
    %79 = vector.extract_strided_slice %10 {offsets = [0, 24], sizes = [8, 8], strides = [1, 1]} : vector<16x32xf32> to vector<8x8xf32>
    %cst_29 = arith.constant dense<0.000000e+00> : vector<8x8xf32>
    %80 = tpu.matmul %77, %78, %cst_29 {dimension_numbers = #tpu.dot_dimension_numbers<[1], [1], [0], [0], [0, 0, 1, 0], [], []>} : vector<8x8xf32>, vector<8x8xf32>, vector<8x8xf32> -> vector<8x8xf32>
    %cst_30 = arith.constant -1.000000e+30 : f32
    %81 = vector.broadcast %cst_30 : f32 to vector<8x8xf32>
    %82 = arith.select %15, %80, %81 : vector<8x8xi1>, vector<8x8xf32>
    %cst_31 = arith.constant dense<0xFF800000> : vector<8xf32>
    %83 = vector.multi_reduction <maximumf>, %82, %cst_31 [1] : vector<8x8xf32> to vector<8xf32>
    %84 = vector.shape_cast %83 : vector<8xf32> to vector<8x1xf32>
    %85 = vector.broadcast %84 : vector<8x1xf32> to vector<8x8xf32>
    %86 = arith.subf %82, %85 : vector<8x8xf32>
    %87 = math.exp %86 : vector<8x8xf32>
    %cst_32 = arith.constant dense<0.000000e+00> : vector<8xf32>
    %88 = vector.multi_reduction <add>, %87, %cst_32 [1] : vector<8x8xf32> to vector<8xf32>
    %89 = vector.shape_cast %88 : vector<8xf32> to vector<8x1xf32>
    %90 = tpu.reciprocal %89 {approx = true} : vector<8x1xf32> -> vector<8x1xf32>
    %91 = vector.broadcast %90 : vector<8x1xf32> to vector<8x8xf32>
    %92 = arith.mulf %87, %91 : vector<8x8xf32>
    %cst_33 = arith.constant dense<0.000000e+00> : vector<8x8xf32>
    %93 = tpu.matmul %92, %79, %cst_33 {dimension_numbers = #tpu.dot_dimension_numbers<[1], [0], [0], [1], [0, 0, 1, 1], [], []>} : vector<8x8xf32>, vector<8x8xf32>, vector<8x8xf32> -> vector<8x8xf32>
    %94 = vector.extract_strided_slice %11 {offsets = [24, 0], sizes = [8, 32], strides = [1, 1]} : vector<32x32xf32> to vector<8x32xf32>
    %cst_34 = arith.constant dense<0.000000e+00> : vector<8x32xf32>
    %95 = tpu.matmul %93, %94, %cst_34 {dimension_numbers = #tpu.dot_dimension_numbers<[1], [0], [0], [1], [0, 0, 1, 1], [], []>} : vector<8x8xf32>, vector<8x32xf32>, vector<8x32xf32> -> vector<8x32xf32>
    %96 = arith.addf %76, %95 : vector<8x32xf32>
    %97 = vector.broadcast %12 : vector<1x32xf32> to vector<8x32xf32>
    %98 = arith.addf %96, %97 : vector<8x32xf32>
    %c0_35 = arith.constant 0 : index
    %c0_36 = arith.constant 0 : index
    %99 = vector.load %arg6[%c0_35, %c0_36] : memref<16x32xf32, #tpu.memory_space<vmem>>, vector<8x32xf32>
    tpu.vector_store %arg6[%c0_35, %c0_36], %98 {strides = array<i32>} : memref<16x32xf32, #tpu.memory_space<vmem>>, vector<8x32xf32>,
    %cst_37 = arith.constant 0.000000e+00 : f32
    %100 = vector.broadcast %cst_37 : f32 to vector<8x32xf32>
    %101 = vector.extract_strided_slice %8 {offsets = [8, 0], sizes = [8, 8], strides = [1, 1]} : vector<16x32xf32> to vector<8x8xf32>
    %102 = vector.extract_strided_slice %9 {offsets = [8, 0], sizes = [8, 8], strides = [1, 1]} : vector<16x32xf32> to vector<8x8xf32>
    %103 = vector.extract_strided_slice %10 {offsets = [8, 0], sizes = [8, 8], strides = [1, 1]} : vector<16x32xf32> to vector<8x8xf32>
    %cst_38 = arith.constant dense<0.000000e+00> : vector<8x8xf32>
    %104 = tpu.matmul %101, %102, %cst_38 {dimension_numbers = #tpu.dot_dimension_numbers<[1], [1], [0], [0], [0, 0, 1, 0], [], []>} : vector<8x8xf32>, vector<8x8xf32>, vector<8x8xf32> -> vector<8x8xf32>
    %cst_39 = arith.constant -1.000000e+30 : f32
    %105 = vector.broadcast %cst_39 : f32 to vector<8x8xf32>
    %106 = arith.select %15, %104, %105 : vector<8x8xi1>, vector<8x8xf32>
    %cst_40 = arith.constant dense<0xFF800000> : vector<8xf32>
    %107 = vector.multi_reduction <maximumf>, %106, %cst_40 [1] : vector<8x8xf32> to vector<8xf32>
    %108 = vector.shape_cast %107 : vector<8xf32> to vector<8x1xf32>
    %109 = vector.broadcast %108 : vector<8x1xf32> to vector<8x8xf32>
    %110 = arith.subf %106, %109 : vector<8x8xf32>
    %111 = math.exp %110 : vector<8x8xf32>
    %cst_41 = arith.constant dense<0.000000e+00> : vector<8xf32>
    %112 = vector.multi_reduction <add>, %111, %cst_41 [1] : vector<8x8xf32> to vector<8xf32>
    %113 = vector.shape_cast %112 : vector<8xf32> to vector<8x1xf32>
    %114 = tpu.reciprocal %113 {approx = true} : vector<8x1xf32> -> vector<8x1xf32>
    %115 = vector.broadcast %114 : vector<8x1xf32> to vector<8x8xf32>
    %116 = arith.mulf %111, %115 : vector<8x8xf32>
    %cst_42 = arith.constant dense<0.000000e+00> : vector<8x8xf32>
    %117 = tpu.matmul %116, %103, %cst_42 {dimension_numbers = #tpu.dot_dimension_numbers<[1], [0], [0], [1], [0, 0, 1, 1], [], []>} : vector<8x8xf32>, vector<8x8xf32>, vector<8x8xf32> -> vector<8x8xf32>
    %118 = vector.extract_strided_slice %11 {offsets = [0, 0], sizes = [8, 32], strides = [1, 1]} : vector<32x32xf32> to vector<8x32xf32>
    %cst_43 = arith.constant dense<0.000000e+00> : vector<8x32xf32>
    %119 = tpu.matmul %117, %118, %cst_43 {dimension_numbers = #tpu.dot_dimension_numbers<[1], [0], [0], [1], [0, 0, 1, 1], [], []>} : vector<8x8xf32>, vector<8x32xf32>, vector<8x32xf32> -> vector<8x32xf32>
    %120 = arith.addf %100, %119 : vector<8x32xf32>
    %121 = vector.extract_strided_slice %8 {offsets = [8, 8], sizes = [8, 8], strides = [1, 1]} : vector<16x32xf32> to vector<8x8xf32>
    %122 = vector.extract_strided_slice %9 {offsets = [8, 8], sizes = [8, 8], strides = [1, 1]} : vector<16x32xf32> to vector<8x8xf32>
    %123 = vector.extract_strided_slice %10 {offsets = [8, 8], sizes = [8, 8], strides = [1, 1]} : vector<16x32xf32> to vector<8x8xf32>
    %cst_44 = arith.constant dense<0.000000e+00> : vector<8x8xf32>
    %124 = tpu.matmul %121, %122, %cst_44 {dimension_numbers = #tpu.dot_dimension_numbers<[1], [1], [0], [0], [0, 0, 1, 0], [], []>} : vector<8x8xf32>, vector<8x8xf32>, vector<8x8xf32> -> vector<8x8xf32>
    %cst_45 = arith.constant -1.000000e+30 : f32
    %125 = vector.broadcast %cst_45 : f32 to vector<8x8xf32>
    %126 = arith.select %15, %124, %125 : vector<8x8xi1>, vector<8x8xf32>
    %cst_46 = arith.constant dense<0xFF800000> : vector<8xf32>
    %127 = vector.multi_reduction <maximumf>, %126, %cst_46 [1] : vector<8x8xf32> to vector<8xf32>
    %128 = vector.shape_cast %127 : vector<8xf32> to vector<8x1xf32>
    %129 = vector.broadcast %128 : vector<8x1xf32> to vector<8x8xf32>
    %130 = arith.subf %126, %129 : vector<8x8xf32>
    %131 = math.exp %130 : vector<8x8xf32>
    %cst_47 = arith.constant dense<0.000000e+00> : vector<8xf32>
    %132 = vector.multi_reduction <add>, %131, %cst_47 [1] : vector<8x8xf32> to vector<8xf32>
    %133 = vector.shape_cast %132 : vector<8xf32> to vector<8x1xf32>
    %134 = tpu.reciprocal %133 {approx = true} : vector<8x1xf32> -> vector<8x1xf32>
    %135 = vector.broadcast %134 : vector<8x1xf32> to vector<8x8xf32>
    %136 = arith.mulf %131, %135 : vector<8x8xf32>
    %cst_48 = arith.constant dense<0.000000e+00> : vector<8x8xf32>
    %137 = tpu.matmul %136, %123, %cst_48 {dimension_numbers = #tpu.dot_dimension_numbers<[1], [0], [0], [1], [0, 0, 1, 1], [], []>} : vector<8x8xf32>, vector<8x8xf32>, vector<8x8xf32> -> vector<8x8xf32>
    %138 = vector.extract_strided_slice %11 {offsets = [8, 0], sizes = [8, 32], strides = [1, 1]} : vector<32x32xf32> to vector<8x32xf32>
    %cst_49 = arith.constant dense<0.000000e+00> : vector<8x32xf32>
    %139 = tpu.matmul %137, %138, %cst_49 {dimension_numbers = #tpu.dot_dimension_numbers<[1], [0], [0], [1], [0, 0, 1, 1], [], []>} : vector<8x8xf32>, vector<8x32xf32>, vector<8x32xf32> -> vector<8x32xf32>
    %140 = arith.addf %120, %139 : vector<8x32xf32>
    %141 = vector.extract_strided_slice %8 {offsets = [8, 16], sizes = [8, 8], strides = [1, 1]} : vector<16x32xf32> to vector<8x8xf32>
    %142 = vector.extract_strided_slice %9 {offsets = [8, 16], sizes = [8, 8], strides = [1, 1]} : vector<16x32xf32> to vector<8x8xf32>
    %143 = vector.extract_strided_slice %10 {offsets = [8, 16], sizes = [8, 8], strides = [1, 1]} : vector<16x32xf32> to vector<8x8xf32>
    %cst_50 = arith.constant dense<0.000000e+00> : vector<8x8xf32>
    %144 = tpu.matmul %141, %142, %cst_50 {dimension_numbers = #tpu.dot_dimension_numbers<[1], [1], [0], [0], [0, 0, 1, 0], [], []>} : vector<8x8xf32>, vector<8x8xf32>, vector<8x8xf32> -> vector<8x8xf32>
    %cst_51 = arith.constant -1.000000e+30 : f32
    %145 = vector.broadcast %cst_51 : f32 to vector<8x8xf32>
    %146 = arith.select %15, %144, %145 : vector<8x8xi1>, vector<8x8xf32>
    %cst_52 = arith.constant dense<0xFF800000> : vector<8xf32>
    %147 = vector.multi_reduction <maximumf>, %146, %cst_52 [1] : vector<8x8xf32> to vector<8xf32>
    %148 = vector.shape_cast %147 : vector<8xf32> to vector<8x1xf32>
    %149 = vector.broadcast %148 : vector<8x1xf32> to vector<8x8xf32>
    %150 = arith.subf %146, %149 : vector<8x8xf32>
    %151 = math.exp %150 : vector<8x8xf32>
    %cst_53 = arith.constant dense<0.000000e+00> : vector<8xf32>
    %152 = vector.multi_reduction <add>, %151, %cst_53 [1] : vector<8x8xf32> to vector<8xf32>
    %153 = vector.shape_cast %152 : vector<8xf32> to vector<8x1xf32>
    %154 = tpu.reciprocal %153 {approx = true} : vector<8x1xf32> -> vector<8x1xf32>
    %155 = vector.broadcast %154 : vector<8x1xf32> to vector<8x8xf32>
    %156 = arith.mulf %151, %155 : vector<8x8xf32>
    %cst_54 = arith.constant dense<0.000000e+00> : vector<8x8xf32>
    %157 = tpu.matmul %156, %143, %cst_54 {dimension_numbers = #tpu.dot_dimension_numbers<[1], [0], [0], [1], [0, 0, 1, 1], [], []>} : vector<8x8xf32>, vector<8x8xf32>, vector<8x8xf32> -> vector<8x8xf32>
    %158 = vector.extract_strided_slice %11 {offsets = [16, 0], sizes = [8, 32], strides = [1, 1]} : vector<32x32xf32> to vector<8x32xf32>
    %cst_55 = arith.constant dense<0.000000e+00> : vector<8x32xf32>
    %159 = tpu.matmul %157, %158, %cst_55 {dimension_numbers = #tpu.dot_dimension_numbers<[1], [0], [0], [1], [0, 0, 1, 1], [], []>} : vector<8x8xf32>, vector<8x32xf32>, vector<8x32xf32> -> vector<8x32xf32>
    %160 = arith.addf %140, %159 : vector<8x32xf32>
    %161 = vector.extract_strided_slice %8 {offsets = [8, 24], sizes = [8, 8], strides = [1, 1]} : vector<16x32xf32> to vector<8x8xf32>
    %162 = vector.extract_strided_slice %9 {offsets = [8, 24], sizes = [8, 8], strides = [1, 1]} : vector<16x32xf32> to vector<8x8xf32>
    %163 = vector.extract_strided_slice %10 {offsets = [8, 24], sizes = [8, 8], strides = [1, 1]} : vector<16x32xf32> to vector<8x8xf32>
    %cst_56 = arith.constant dense<0.000000e+00> : vector<8x8xf32>
    %164 = tpu.matmul %161, %162, %cst_56 {dimension_numbers = #tpu.dot_dimension_numbers<[1], [1], [0], [0], [0, 0, 1, 0], [], []>} : vector<8x8xf32>, vector<8x8xf32>, vector<8x8xf32> -> vector<8x8xf32>
    %cst_57 = arith.constant -1.000000e+30 : f32
    %165 = vector.broadcast %cst_57 : f32 to vector<8x8xf32>
    %166 = arith.select %15, %164, %165 : vector<8x8xi1>, vector<8x8xf32>
    %cst_58 = arith.constant dense<0xFF800000> : vector<8xf32>
    %167 = vector.multi_reduction <maximumf>, %166, %cst_58 [1] : vector<8x8xf32> to vector<8xf32>
    %168 = vector.shape_cast %167 : vector<8xf32> to vector<8x1xf32>
    %169 = vector.broadcast %168 : vector<8x1xf32> to vector<8x8xf32>
    %170 = arith.subf %166, %169 : vector<8x8xf32>
    %171 = math.exp %170 : vector<8x8xf32>
    %cst_59 = arith.constant dense<0.000000e+00> : vector<8xf32>
    %172 = vector.multi_reduction <add>, %171, %cst_59 [1] : vector<8x8xf32> to vector<8xf32>
    %173 = vector.shape_cast %172 : vector<8xf32> to vector<8x1xf32>
    %174 = tpu.reciprocal %173 {approx = true} : vector<8x1xf32> -> vector<8x1xf32>
    %175 = vector.broadcast %174 : vector<8x1xf32> to vector<8x8xf32>
    %176 = arith.mulf %171, %175 : vector<8x8xf32>
    %cst_60 = arith.constant dense<0.000000e+00> : vector<8x8xf32>
    %177 = tpu.matmul %176, %163, %cst_60 {dimension_numbers = #tpu.dot_dimension_numbers<[1], [0], [0], [1], [0, 0, 1, 1], [], []>} : vector<8x8xf32>, vector<8x8xf32>, vector<8x8xf32> -> vector<8x8xf32>
    %178 = vector.extract_strided_slice %11 {offsets = [24, 0], sizes = [8, 32], strides = [1, 1]} : vector<32x32xf32> to vector<8x32xf32>
    %cst_61 = arith.constant dense<0.000000e+00> : vector<8x32xf32>
    %179 = tpu.matmul %177, %178, %cst_61 {dimension_numbers = #tpu.dot_dimension_numbers<[1], [0], [0], [1], [0, 0, 1, 1], [], []>} : vector<8x8xf32>, vector<8x32xf32>, vector<8x32xf32> -> vector<8x32xf32>
    %180 = arith.addf %160, %179 : vector<8x32xf32>
    %181 = vector.broadcast %12 : vector<1x32xf32> to vector<8x32xf32>
    %182 = arith.addf %180, %181 : vector<8x32xf32>
    %c8 = arith.constant 8 : index
    %c0_62 = arith.constant 0 : index
    %183 = vector.load %arg6[%c8, %c0_62] : memref<16x32xf32, #tpu.memory_space<vmem>>, vector<8x32xf32>
    tpu.vector_store %arg6[%c8, %c0_62], %182 {strides = array<i32>} : memref<16x32xf32, #tpu.memory_space<vmem>>, vector<8x32xf32>,
    return
  }
  func.func @transform_0(%arg0: i32) -> (i32, i32) {
    %c0_i32 = arith.constant 0 : i32
    %c0_i32_0 = arith.constant 0 : i32
    return %arg0, %c0_i32 : i32, i32
  }
  func.func @transform_1(%arg0: i32) -> (i32, i32) {
    %c0_i32 = arith.constant 0 : i32
    %c0_i32_0 = arith.constant 0 : i32
    %c0_i32_1 = arith.constant 0 : i32
    return %c0_i32, %c0_i32_0 : i32, i32
  }
  func.func @transform_2(%arg0: i32) -> (i32, i32) {
    %c0_i32 = arith.constant 0 : i32
    %c0_i32_0 = arith.constant 0 : i32
    %c0_i32_1 = arith.constant 0 : i32
    return %c0_i32, %c0_i32_0 : i32, i32
  }
  func.func @transform_3(%arg0: i32) -> (i32, i32) {
    %c0_i32 = arith.constant 0 : i32
    %c0_i32_0 = arith.constant 0 : i32
    %c0_i32_1 = arith.constant 0 : i32
    return %c0_i32, %c0_i32_0 : i32, i32
  }
  func.func @transform_4(%arg0: i32) -> (i32, i32) {
    %c0_i32 = arith.constant 0 : i32
    %c0_i32_0 = arith.constant 0 : i32
    %c0_i32_1 = arith.constant 0 : i32
    return %c0_i32, %c0_i32_0 : i32, i32
  }
  func.func @transform_5(%arg0: i32) -> (i32, i32) {
    %c0_i32 = arith.constant 0 : i32
    %c0_i32_0 = arith.constant 0 : i32
    return %arg0, %c0_i32 : i32, i32
  }
}

</mosaic_0001>

<bundles_post_ra>
// kernel: tpu_custom_call.1
= control target key start
LH: loop header
LB: loop body
LE: loop exit
PB: predicated region body
PF: predicated region fallthrough
CT: control target
= control target key end

     0   :  { %10 = vsyncpa [#allocation3], 0  ;;  %s2833_s0 = inlined_call_operand.hbm [shape: f32[16,32], index: 0, kind: input, shape index: {}]   ;;  %s2834_s1 = inlined_call_operand.hbm [shape: f32[32,96], index: 1, kind: input, shape index: {}]   ;;  %s2835_s2 = inlined_call_operand.vmem [shape: f32[1,96], index: 2, kind: input, shape index: {}]   ;;  %s2836_s3 = inlined_call_operand.hbm [shape: f32[32,32], index: 3, kind: input, shape index: {}]   ;;  %s2837_s4 = inlined_call_operand.vmem [shape: f32[1,32], index: 4, kind: input, shape index: {}]   ;;  %s2838_s5 = inlined_call_operand.hbm [shape: f32[16,32], index: 5, kind: output, shape index: {}]  }
   0x1   :  { %11 = vsyncpa [#allocation6], 0 }
   0x2   :  { %12 = vsyncpa [#allocation4], 0  ;;  %s2488_s18 = smov [#allocation5]   ;;  %s2489_s20 = smov [#allocation2]  }
   0x3   :  { %s30_s19 = sshll.u32 %s2488_s18, 4  ;;  %s18_s21 = sshll.u32 %s2489_s20, 4  ;;  %s31_s19 = int_to_ptr.vmem [resolvable:$true] %s30_s19  ;;  %s2537_s21 = int_to_ptr.vmem [resolvable:$true] %s18_s21 }
   0x4   :  { %s2394_s24 = scalar_lea.hbm %s2834_s1, 512 }
   0x5   :  { %p2395_p0 = scmp.ne.s32.totalorder %s2834_s1, %s2394_s24  ;;  %p2398_p1 = scmp.lt.u32.totalorder %s2394_s24, %s2834_s1 }
   0x7   :  { %p2400_p2 = pnand %p2398_p1, %p2395_p0 }
   0x9   :  { %2403 = shalt.err (!%p2400_p2)
}
   0xa   :  { %s2404_s29 = scalar_lea.vmem %s31_s19, 512  ;;  %p2409_p4 = scmp.lt.s32.totalorder %s31_s19, %s31_s19 }
   0xb   :  { %p2405_p3 = scmp.ne.s32.totalorder %s31_s19, %s2404_s29  ;;  %p2410_p5 = scmp.lt.s32.totalorder %s2404_s29, %s2404_s29 }
   0xd   :  { %p2411_p6 = por %p2410_p5, %p2409_p4 }
   0xf   :  { %p2412_p7 = pnand %p2411_p6, %p2405_p3 }
  0x11   :  { %2415 = shalt.err (!%p2412_p7)
}
  0x12   :  { %s2490_s30 = smov 128   ;;  %s2491_s6 = smov 8  }
  0x13   :  { %36 = dma.hbm_to_vmem [thread:$0]  %s2834_s1, 512, %s31_s19, [#allocation6], %s2490_s30, %s2490_s30, %s2491_s6  }
  0x14   :  { %s2416_s11 = scalar_lea.hbm %s2833_s0, 256 }
  0x15   :  { %p2417_p8 = scmp.ne.s32.totalorder %s2833_s0, %s2416_s11  ;;  %p2420_p9 = scmp.lt.u32.totalorder %s2416_s11, %s2833_s0 }
  0x17   :  { %p2422_p10 = pnand %p2420_p9, %p2417_p8 }
  0x19   :  { %2425 = shalt.err (!%p2422_p10)
}
  0x1a   :  { %s2426_s16 = scalar_lea.vmem %s2537_s21, 256  ;;  %p2431_p12 = scmp.lt.s32.totalorder %s2537_s21, %s2537_s21 }
  0x1b   :  { %p2427_p11 = scmp.ne.s32.totalorder %s2537_s21, %s2426_s16  ;;  %p2432_p13 = scmp.lt.s32.totalorder %s2426_s16, %s2426_s16 }
  0x1d   :  { %p2433_p0 = por %p2432_p13, %p2431_p12 }
  0x1f   :  { %p2434_p1 = pnand %p2433_p0, %p2427_p11 }
  0x21   :  { %2437 = shalt.err (!%p2434_p1)
}
  0x22   :  { %24 = dma.hbm_to_vmem [thread:$0]  %s2833_s0, 256, %s2537_s21, [#allocation3], %s2490_s30, %s2490_s30, %s2491_s6  }
  0x23   :  { %s2492_s18 = smov [#allocation7]   ;;  %s2438_s23 = scalar_lea.hbm %s2836_s3, 512 }
  0x24   :  { %s44_s19 = sshll.u32 %s2492_s18, 4  ;;  %p2439_p2 = scmp.ne.s32.totalorder %s2836_s3, %s2438_s23  ;;  %s45_s19 = int_to_ptr.vmem [resolvable:$true] %s44_s19 }
  0x25   :  { %p2442_p3 = scmp.lt.u32.totalorder %s2438_s23, %s2836_s3 }
  0x27   :  { %p2444_p4 = pnand %p2442_p3, %p2439_p2 }
  0x29   :  { %2447 = shalt.err (!%p2444_p4)
}
  0x2a   :  { %s2448_s28 = scalar_lea.vmem %s45_s19, 512  ;;  %p2453_p6 = scmp.lt.s32.totalorder %s45_s19, %s45_s19 }
  0x2b   :  { %p2449_p5 = scmp.ne.s32.totalorder %s45_s19, %s2448_s28  ;;  %p2454_p7 = scmp.lt.s32.totalorder %s2448_s28, %s2448_s28 }
  0x2d   :  { %p2455_p8 = por %p2454_p7, %p2453_p6 }
  0x2f   :  { %p2456_p9 = pnand %p2455_p8, %p2449_p5 }
  0x31   :  { %2459 = shalt.err (!%p2456_p9)
}
  0x32   :  { %50 = dma.hbm_to_vmem [thread:$0]  %s2836_s3, 512, %s45_s19, [#allocation6], %s2490_s30, %s2490_s30, %s2491_s6  }
  0x33   :  { %2482 = dma.done.wait [#allocation3], 256  }
  0x34   :  { %2483 = vsyncadd [#allocation3], 4294967040 }
  0x35   :  { %2484 = dma.done.wait [#allocation6], 1024  }
  0x36   :  { %2485 = vsyncadd [#allocation6], 4294966272  ;;  %vm75_vm0 = vcmask 261120   ;;  %v64_v0 = vld [vmem:[#allocation5] sm:$0xff]  ;;  %v65_v1 = vld [vmem:[#allocation5 + $0x8] sm:$0xff]  ;;  %v2493_v8 = vmov 0.0   ;;  %v164_v18 = vlaneseq }
  0x37   :  { %v66_v2 = vld [vmem:[#allocation5 + $0x10] sm:$0xff]  ;;  %v2335_v3 = vpack.c.bf16 %v65_v1, %v64_v0  ;;  %v67_v4 = vld [vmem:[#allocation5 + $0x18] sm:$0xff]  ;;  %2215 = vmatprep.subr.mxu1 %v2493_v8  ;;  %vm2494_vm1 = vmmov 0   ;;  %s2495_s7 = smov 96   ;;  %s2496_s8 = smov 120   ;;  %vm172_vm2 = vcmask 64512  }
  0x38   :  { %v62_v5 = vld [vmem:[#allocation2] sm:$0xff]  ;;  %v2339_v6 = vpack.c.bf16 %v67_v4, %v66_v2  ;;  %v63_v7 = vld [vmem:[#allocation2 + $0x8] sm:$0xff]  ;;  %2217 = vmatprep.mubr.msk.f32.mxu1 %vm2494_vm1, %v2493_v8  ;;  %s2497_s9 = smov 88   ;;  %v165_v19 = vshrl.u32 %v164_v18, 7  ;;  %v167_v20 = vand.u32 127, %v164_v18  ;;  %s2499_s10 = smov 64  }
  0x39   :  { %2212 = vmatprep.mubr.msk.f32.mxu0 %vm75_vm0, %v62_v5  ;;  %2336 = vmatprep.subr.bf16.mxu0 %v2335_v3  ;;  %v2114_v9 = vld [vmem:[%s2835_s2] ss:$0 sm:$0xff]  ;;  %s2498_s2 = smov 56   ;;  %s2500_s11 = smov 80   ;;  %v2644_v40 = vld [vmem:[#allocation7 + $0x8] sm:$0xff]  ;;  %v2656_v49 = vld [vmem:[#allocation7] sm:$0xff] }
  0x3a   :  { %2338 = vmatpush3.bf16.msra.mxu0 %v2335_v3  ;;  %vm2624_vm3 = vcmp.ge.s32.totalorder %v165_v19, %v167_v20  ;;  %s2501_s12 = smov 112   ;;  %s2502_s13 = smov 72  }
  0x3b   :  { %2340 = vmatprep.subr.bf16.mxu0 %v2339_v6  ;;  %s2503_s14 = smov 104   ;;  %s2504_s15 = smov 48  }
  0x3c   :  { %s2505_s16 = smov 40  }
  0x3e   :  { %2342 = vmatpush3.bf16.msra.mxu0 %v2339_v6 }
  0x3f   :  { %2225 = vmatprep.subr.mxu0 %v2493_v8 }
  0x41   :  { %2213 = vmatmul.mubr.msk.f32.vlgmr.msra.gmra.mrb[0].mxu0 %vm75_vm0, %v63_v7 }
  0x42   :  { %2227 = vmatprep.mubr.msk.f32.mxu0 %vm2494_vm1, %v2493_v8 }
 0x114   :  { %v2214_v10 = vpop.f32.mrb[0].mxu0 }
 0x115   :  { %v2600_v11 = vadd.f32 %v2214_v10, %v2114_v9  ;;  %v148_v12 = vpop.f32.mrb[1].mxu0 }
 0x116   :  { %v2602_v13 = vadd.f32 %v2114_v9, %v148_v12 }
 0x118   :  { %170 = vrot.lane.b32.xlu0 %v2602_v13, %s2495_s7  ;;  %v2607_v14 = vmul.f32 0.35355338, %v2602_v13 }
 0x11a   :  { %336 = vrot.lane.b32.xlu1 %v2607_v14, %s2496_s8 }
 0x11c   :  { %338 = vrot.lane.b32.xlu0 %v2602_v13, %s2497_s9 }
 0x18a   :  { %v171_v15 = vpop.permute.xlu0 %170 }
 0x18b   :  { %2216 = vmatpush3.xpose.msk.msra.mxu1 %vm172_vm2, %v171_v15  ;;  %v2694_v15 = vld [vmem:[#allocation7 + $0x10] sm:$0xff] }
 0x18c   :  { %2220 = vmatprep.subr.mxu1 %v2493_v8  ;;  %v337_v17 = vpop.permute.xlu1 %336 }
 0x18e   :  { %v339_v16 = vpop.permute.xlu0 %338  ;;  %2218 = vmatmul.mubr.msk.f32.vlgmr.msra.gmra.mrb[0].mxu1 %vm172_vm2, %v2607_v14 }
 0x18f   :  { %2226 = vmatpush3.xpose.msk.msra.mxu0 %vm172_vm2, %v339_v16  ;;  %2222 = vmatprep.mubr.msk.f32.mxu1 %vm2494_vm1, %v2493_v8 }
 0x190   :  { %2235 = vmatprep.subr.mxu0 %v2493_v8 }
 0x192   :  { %2228 = vmatmul.mubr.msk.f32.vlgmr.msra.gmra.mrb[2].mxu0 %vm172_vm2, %v337_v17 }
 0x193   :  { %2237 = vmatprep.mubr.msk.f32.mxu0 %vm2494_vm1, %v2493_v8  ;;  %2236 = vmatpush3.msra.mxu0 %v2644_v40 }
 0x194   :  { %2245 = vmatprep.subr.mxu0 %v2493_v8 }
 0x261   :  { %v244_v22 = vpop.f32.mrb[0].mxu1 }
 0x262   :  { %v248_v23 = vsel %vm2624_vm3, %v244_v22, -1e+30  ;;  %v2219_v24 = vpop.f32.mrb[1].mxu1 }
 0x263   :  { %v249_v25 = vsel %vm172_vm2, %v248_v23, -inf }
 0x264   :  { %250 = vmax.xlane.f32.xlu1 %v249_v25 }
 0x265   :  { %v410_v26 = vpop.f32.mrb[2].mxu0 }
 0x266   :  { %v414_v27 = vsel %vm2624_vm3, %v410_v26, -1e+30  ;;  %v2229_v28 = vpop.f32.mrb[3].mxu0 }
 0x267   :  { %v415_v29 = vsel %vm172_vm2, %v414_v27, -inf }
 0x268   :  { %416 = vmax.xlane.f32.xlu0 %v415_v29  ;;  %v2711_v29 = vmul.f32 0.35355338, %v2600_v11 }
 0x2f1   :  { %v251_v30 = vpop.xlane.xlu1 %250 }
 0x2f2   :  { %v252_v31 = vsub.f32 %v248_v23, %v251_v30 }
 0x2f4   :  { %v253_v32 = vmul.f32 1.442695, %v252_v31 }
 0x2f5   :  { %v417_v33 = vpop.xlane.xlu0 %416 }
 0x2f6   :  { %2362 = vpow2.f32 %v253_v32  ;;  %v418_v34 = vsub.f32 %v414_v27, %v417_v33 }
 0x2f8   :  { %v419_v35 = vmul.f32 1.442695, %v418_v34 }
 0x2fa   :  { %2364 = vpow2.f32 %v419_v35 }
 0x300   :  { %v2363_v36 = vpop.eup %2362 }
 0x301   :  { %v255_v37 = vsel %vm172_vm2, %v2363_v36, 0.0 }
 0x302   :  { %256 = vadd.xlane.f32.xlu0 %v255_v37 }
 0x304   :  { %v2365_v38 = vpop.eup %2364 }
 0x305   :  { %v421_v39 = vsel %vm172_vm2, %v2365_v38, 0.0 }
 0x306   :  { %422 = vadd.xlane.f32.xlu1 %v421_v39 }
 0x317   :  { %426 = vrot.lane.b32.xlu1 %v2602_v13, %s2498_s2 }
 0x318   :  { %260 = vrot.lane.b32.xlu0 %v2602_v13, %s2499_s10 }
 0x31b   :  { %650 = vrot.lane.b32.xlu1 %v2602_v13, %s2500_s11 }
 0x31c   :  { %648 = vrot.lane.b32.xlu0 %v2607_v14, %s2501_s12 }
 0x38f   :  { %v257_v41 = vpop.xlane.xlu0 %256 }
 0x390   :  { %2366 = vrcp.f32 %v257_v41 }
 0x393   :  { %v261_v42 = vpop.permute.xlu0 %260  ;;  %v423_v43 = vpop.xlane.xlu1 %422 }
 0x394   :  { %2368 = vrcp.f32 %v423_v43  ;;  %2221 = vmatpush3.msra.mxu1 %v261_v42 }
 0x395   :  { %2230 = vmatprep.subr.mxu1 %v2493_v8 }
 0x397   :  { %v427_v46 = vpop.permute.xlu1 %426  ;;  %v649_v55 = vpop.permute.xlu0 %648 }
 0x39a   :  { %v2367_v44 = vpop.eup %2366 }
 0x39b   :  { %v259_v45 = vmul.f32 %v2367_v44, %v2363_v36  ;;  %v651_v53 = vpop.permute.xlu1 %650 }
 0x39d   :  { %2223 = vmatmul.mubr.msk.f32.vlgmr.msra.gmra.mrb[2].mxu1 %vm172_vm2, %v259_v45 }
 0x39e   :  { %v2369_v47 = vpop.eup %2368  ;;  %2231 = vmatpush3.msra.mxu1 %v427_v46  ;;  %2232 = vmatprep.mubr.msk.f32.mxu1 %vm2494_vm1, %v2493_v8 }
 0x39f   :  { %v425_v48 = vmul.f32 %v2369_v47, %v2365_v38  ;;  %2240 = vmatprep.subr.mxu1 %v2493_v8  ;;  %v2732_v38 = vld [vmem:[#allocation7 + $0x18] sm:$0xff] }
 0x3a1   :  { %2233 = vmatmul.mubr.msk.f32.vlgmr.msra.gmra.mrb[4].mxu1 %vm172_vm2, %v425_v48 }
 0x3a2   :  { %2242 = vmatprep.mubr.msk.f32.mxu1 %vm2494_vm1, %v2493_v8  ;;  %2241 = vmatpush3.msra.mxu1 %v2656_v49 }
 0x3a3   :  { %2250 = vmatprep.subr.mxu1 %v2493_v8 }
 0x470   :  { %v332_v50 = vpop.f32.mrb[2].mxu1 }
 0x471   :  { %v2224_v51 = vpop.f32.mrb[3].mxu1  ;;  %2243 = vmatmul.mubr.msk.f32.vlgmr.msra.gmra.mrb[6].mxu1 %vm172_vm2, %v332_v50 }
 0x472   :  { %2252 = vmatprep.mubr.msk.f32.mxu1 %vm2494_vm1, %v2493_v8 }
 0x474   :  { %v498_v52 = vpop.f32.mrb[4].mxu1 }
 0x475   :  { %v2234_v54 = vpop.f32.mrb[5].mxu1  ;;  %2238 = vmatmul.mubr.msk.f32.vlgmr.msra.gmra.mrb[4].mxu0 %vm172_vm2, %v498_v52 }
 0x476   :  { %2246 = vmatpush3.xpose.msk.msra.mxu0 %vm172_vm2, %v651_v53  ;;  %2247 = vmatprep.mubr.msk.f32.mxu0 %vm2494_vm1, %v2493_v8 }
 0x477   :  { %2255 = vmatprep.subr.mxu0 %v2493_v8 }
 0x479   :  { %2248 = vmatmul.mubr.msk.f32.vlgmr.msra.gmra.mrb[6].mxu0 %vm172_vm2, %v649_v55 }
 0x47a   :  { %2257 = vmatprep.mubr.msk.f32.mxu0 %vm2494_vm1, %v2493_v8  ;;  %2256 = vmatpush3.msra.mxu0 %v2694_v15 }
 0x47b   :  { %2265 = vmatprep.subr.mxu0 %v2493_v8 }
 0x544   :  { %v644_v56 = vpop.f32.mrb[6].mxu1 }
 0x545   :  { %v2244_v57 = vpop.f32.mrb[7].mxu1 }
 0x548   :  { %v571_v58 = vpop.f32.mrb[4].mxu0 }
 0x549   :  { %v2671_v59 = vadd.f32 %v644_v56, %v571_v58  ;;  %v2239_v60 = vpop.f32.mrb[5].mxu0 }
 0x54c   :  { %v722_v61 = vpop.f32.mrb[6].mxu0 }
 0x54d   :  { %v726_v62 = vsel %vm2624_vm3, %v722_v61, -1e+30  ;;  %v2249_v63 = vpop.f32.mrb[7].mxu0  ;;  %v2759_v61 = vld [vmem:[%s2837_s4] ss:$0 sm:$0xff]  ;;  %s2506_s4 = smov [#allocation8]  }
 0x54e   :  { %v727_v0 = vsel %vm172_vm2, %v726_v62, -inf  ;;  %s2101_s18 = sshll.u32 %s2506_s4, 4  ;;  %s2102_s18 = int_to_ptr.vmem [resolvable:$true] %s2101_s18 }
 0x54f   :  { %728 = vmax.xlane.f32.xlu1 %v727_v0  ;;  %s2460_s19 = scalar_lea.vmem %s2102_s18, 256  ;;  %p2465_p11 = scmp.lt.s32.totalorder %s2102_s18, %s2102_s18 }
 0x550   :  { %p2461_p10 = scmp.ne.s32.totalorder %s2102_s18, %s2460_s19  ;;  %p2466_p12 = scmp.lt.s32.totalorder %s2460_s19, %s2460_s19 }
 0x552   :  { %p2467_p13 = por %p2466_p12, %p2465_p11 }
 0x554   :  { %p2468_p0 = pnand %p2467_p13, %p2461_p10 }
 0x560   :  { %890 = vrot.lane.b32.xlu1 %v2602_v13, %s2502_s13 }
 0x564   :  { %888 = vrot.lane.b32.xlu1 %v2607_v14, %s2503_s14 }
 0x568   :  { %1137 = vrot.lane.b32.xlu1 %v2600_v11, %s2495_s7 }
 0x5dc   :  { %v729_v1 = vpop.xlane.xlu1 %728 }
 0x5dd   :  { %v730_v2 = vsub.f32 %v726_v62, %v729_v1 }
 0x5df   :  { %v731_v3 = vmul.f32 1.442695, %v730_v2 }
 0x5e0   :  { %v891_v10 = vpop.permute.xlu1 %890 }
 0x5e1   :  { %2370 = vpow2.f32 %v731_v3 }
 0x5e4   :  { %v889_v14 = vpop.permute.xlu1 %888 }
 0x5e8   :  { %v1138_v32 = vpop.permute.xlu1 %1137 }
 0x5eb   :  { %v2371_v4 = vpop.eup %2370 }
 0x5ec   :  { %v733_v5 = vsel %vm172_vm2, %v2371_v4, 0.0 }
 0x5ed   :  { %734 = vadd.xlane.f32.xlu0 %v733_v5 }
 0x603   :  { %738 = vrot.lane.b32.xlu0 %v2602_v13, %s2504_s15 }
 0x67a   :  { %v735_v6 = vpop.xlane.xlu0 %734 }
 0x67b   :  { %2372 = vrcp.f32 %v735_v6 }
 0x67e   :  { %v739_v7 = vpop.permute.xlu0 %738 }
 0x67f   :  { %2251 = vmatpush3.msra.mxu1 %v739_v7 }
 0x680   :  { %2260 = vmatprep.subr.mxu1 %v2493_v8 }
 0x685   :  { %v2373_v9 = vpop.eup %2372 }
 0x686   :  { %v737_v12 = vmul.f32 %v2373_v9, %v2371_v4 }
 0x688   :  { %2253 = vmatmul.mubr.msk.f32.vlgmr.msra.gmra.mrb[8].mxu1 %vm172_vm2, %v737_v12 }
 0x689   :  { %2261 = vmatpush3.xpose.msk.msra.mxu1 %vm172_vm2, %v891_v10  ;;  %2262 = vmatprep.mubr.msk.f32.mxu1 %vm2494_vm1, %v2493_v8 }
 0x68a   :  { %2270 = vmatprep.subr.mxu1 %v2493_v8 }
 0x68c   :  { %2263 = vmatmul.mubr.msk.f32.vlgmr.msra.gmra.mrb[10].mxu1 %vm172_vm2, %v889_v14 }
 0x68d   :  { %2272 = vmatprep.mubr.msk.f32.mxu1 %vm2494_vm1, %v2493_v8  ;;  %2271 = vmatpush3.msra.mxu1 %v2732_v38 }
 0x68e   :  { %2280 = vmatprep.subr.mxu1 %v2493_v8 }
 0x75b   :  { %v810_v16 = vpop.f32.mrb[8].mxu1 }
 0x75c   :  { %v2254_v17 = vpop.f32.mrb[9].mxu1  ;;  %2258 = vmatmul.mubr.msk.f32.vlgmr.msra.gmra.mrb[8].mxu0 %vm172_vm2, %v810_v16 }
 0x75d   :  { %2267 = vmatprep.mubr.msk.f32.mxu0 %vm2494_vm1, %v2493_v8 }
 0x75f   :  { %v962_v18 = vpop.f32.mrb[10].mxu1 }
 0x760   :  { %v966_v19 = vsel %vm2624_vm3, %v962_v18, -1e+30  ;;  %v2264_v20 = vpop.f32.mrb[11].mxu1 }
 0x761   :  { %v967_v22 = vsel %vm172_vm2, %v966_v19, -inf }
 0x762   :  { %968 = vmax.xlane.f32.xlu0 %v967_v22 }
 0x778   :  { %978 = vrot.lane.b32.xlu0 %v2602_v13, %s2505_s16 }
 0x77c   :  { %1304 = vrot.lane.b32.xlu0 %v2600_v11, %s2497_s9 }
 0x7ef   :  { %v969_v23 = vpop.xlane.xlu0 %968 }
 0x7f0   :  { %v970_v24 = vsub.f32 %v966_v19, %v969_v23 }
 0x7f2   :  { %v971_v25 = vmul.f32 1.442695, %v970_v24 }
 0x7f3   :  { %v979_v26 = vpop.permute.xlu0 %978 }
 0x7f4   :  { %2374 = vpow2.f32 %v971_v25  ;;  %2266 = vmatpush3.msra.mxu0 %v979_v26 }
 0x7f5   :  { %2275 = vmatprep.subr.mxu0 %v2493_v8 }
 0x7f7   :  { %v1305_v36 = vpop.permute.xlu0 %1304 }
 0x7fe   :  { %v2375_v27 = vpop.eup %2374 }
 0x7ff   :  { %v973_v28 = vsel %vm172_vm2, %v2375_v27, 0.0 }
 0x800   :  { %974 = vadd.xlane.f32.xlu1 %v973_v28 }
 0x811   :  { %1302 = vrot.lane.b32.xlu1 %v2711_v29, %s2496_s8 }
 0x82f   :  { %v883_v13 = vpop.f32.mrb[8].mxu0 }
 0x830   :  { %v887_v30 = vadd.f32 %v883_v13, %v2671_v59  ;;  %v2259_v31 = vpop.f32.mrb[9].mxu0 }
 0x88d   :  { %v975_v33 = vpop.xlane.xlu1 %974 }
 0x88e   :  { %2376 = vrcp.f32 %v975_v33 }
 0x891   :  { %v1303_v37 = vpop.permute.xlu1 %1302 }
 0x898   :  { %v2377_v34 = vpop.eup %2376 }
 0x899   :  { %v977_v35 = vmul.f32 %v2377_v34, %v2375_v27 }
 0x89b   :  { %2268 = vmatmul.mubr.msk.f32.vlgmr.msra.gmra.mrb[10].mxu0 %vm172_vm2, %v977_v35 }
 0x89c   :  { %2276 = vmatpush3.xpose.msk.msra.mxu0 %vm172_vm2, %v1138_v32  ;;  %2277 = vmatprep.mubr.msk.f32.mxu0 %vm2494_vm1, %v2493_v8 }
 0x89d   :  { %2285 = vmatprep.subr.mxu0 %v2493_v8 }
 0x89f   :  { %2278 = vmatmul.mubr.msk.f32.vlgmr.msra.gmra.mrb[12].mxu0 %vm172_vm2, %v2711_v29 }
 0x8a0   :  { %2286 = vmatpush3.xpose.msk.msra.mxu0 %vm172_vm2, %v1305_v36  ;;  %2287 = vmatprep.mubr.msk.f32.mxu0 %vm2494_vm1, %v2493_v8 }
 0x8a1   :  { %2295 = vmatprep.subr.mxu0 %v2493_v8 }
 0x8a3   :  { %2288 = vmatmul.mubr.msk.f32.vlgmr.msra.gmra.mrb[14].mxu0 %vm172_vm2, %v1303_v37 }
 0x8a4   :  { %2296 = vmatpush3.msra.mxu0 %v2644_v40  ;;  %2297 = vmatprep.mubr.msk.f32.mxu0 %vm2494_vm1, %v2493_v8 }
 0x8a5   :  { %2305 = vmatprep.subr.mxu0 %v2493_v8 }
 0x96e   :  { %v1050_v39 = vpop.f32.mrb[10].mxu0 }
 0x96f   :  { %v2269_v41 = vpop.f32.mrb[11].mxu0  ;;  %2273 = vmatmul.mubr.msk.f32.vlgmr.msra.gmra.mrb[12].mxu1 %vm172_vm2, %v1050_v39 }
 0x970   :  { %2282 = vmatprep.mubr.msk.f32.mxu1 %vm2494_vm1, %v2493_v8 }
 0x972   :  { %v1210_v42 = vpop.f32.mrb[12].mxu0 }
 0x973   :  { %v1214_v40 = vsel %vm2624_vm3, %v1210_v42, -1e+30  ;;  %v2279_v43 = vpop.f32.mrb[13].mxu0 }
 0x974   :  { %v1215_v44 = vsel %vm172_vm2, %v1214_v40, -inf }
 0x975   :  { %1216 = vmax.xlane.f32.xlu0 %v1215_v44 }
 0x976   :  { %v1376_v45 = vpop.f32.mrb[14].mxu0 }
 0x977   :  { %v1380_v46 = vsel %vm2624_vm3, %v1376_v45, -1e+30  ;;  %v2289_v47 = vpop.f32.mrb[15].mxu0 }
 0x978   :  { %v1381_v48 = vsel %vm172_vm2, %v1380_v46, -inf }
 0x979   :  { %1382 = vmax.xlane.f32.xlu1 %v1381_v48 }
 0x98a   :  { %1226 = vrot.lane.b32.xlu1 %v2600_v11, %s2499_s10 }
 0x98e   :  { %1616 = vrot.lane.b32.xlu1 %v2600_v11, %s2500_s11 }
 0x992   :  { %1614 = vrot.lane.b32.xlu1 %v2711_v29, %s2501_s12 }
 0xa02   :  { %v1217_v50 = vpop.xlane.xlu0 %1216 }
 0xa03   :  { %v1218_v51 = vsub.f32 %v1214_v40, %v1217_v50 }
 0xa05   :  { %v1219_v52 = vmul.f32 1.442695, %v1218_v51 }
 0xa06   :  { %v1383_v53 = vpop.xlane.xlu1 %1382 }
 0xa07   :  { %2378 = vpow2.f32 %v1219_v52  ;;  %v1384_v54 = vsub.f32 %v1380_v46, %v1383_v53 }
 0xa09   :  { %v1385_v55 = vmul.f32 1.442695, %v1384_v54 }
 0xa0a   :  { %v1227_v56 = vpop.permute.xlu1 %1226 }
 0xa0b   :  { %2380 = vpow2.f32 %v1385_v55  ;;  %2281 = vmatpush3.msra.mxu1 %v1227_v56 }
 0xa0c   :  { %2290 = vmatprep.subr.mxu1 %v2493_v8 }
 0xa0e   :  { %v1617_v14 = vpop.permute.xlu1 %1616 }
 0xa11   :  { %v2379_v57 = vpop.eup %2378 }
 0xa12   :  { %v1221_v58 = vsel %vm172_vm2, %v2379_v57, 0.0 }
 0xa13   :  { %1222 = vadd.xlane.f32.xlu0 %v1221_v58 }
 0xa15   :  { %v2381_v59 = vpop.eup %2380 }
 0xa16   :  { %v1387_v60 = vsel %vm172_vm2, %v2381_v59, 0.0 }
 0xa17   :  { %1388 = vadd.xlane.f32.xlu0 %v1387_v60 }
 0xa2d   :  { %1392 = vrot.lane.b32.xlu0 %v2600_v11, %s2498_s2 }
 0xa42   :  { %v1123_v62 = vpop.f32.mrb[12].mxu1 }
 0xa43   :  { %v1127_v63 = vadd.f32 %v1123_v62, %v887_v30  ;;  %v2274_v0 = vpop.f32.mrb[13].mxu1 }
 0xa45   :  { %v1134_v1 = vadd.f32 %v2759_v61, %v1127_v63 }
 0xa47   :  { %1135 = vst.msk [vmem:[#allocation8] sm:$0xff] %vm75_vm0, %v1134_v1 }
 0xaa0   :  { %v1223_v2 = vpop.xlane.xlu0 %1222 }
 0xaa1   :  { %2382 = vrcp.f32 %v1223_v2 }
 0xaa4   :  { %v1389_v3 = vpop.xlane.xlu0 %1388 }
 0xaa5   :  { %2384 = vrcp.f32 %v1389_v3 }
 0xaa8   :  { %v1393_v6 = vpop.permute.xlu0 %1392 }
 0xaab   :  { %v2383_v4 = vpop.eup %2382 }
 0xaac   :  { %v1225_v5 = vmul.f32 %v2383_v4, %v2379_v57 }
 0xaae   :  { %2283 = vmatmul.mubr.msk.f32.vlgmr.msra.gmra.mrb[14].mxu1 %vm172_vm2, %v1225_v5 }
 0xaaf   :  { %v2385_v7 = vpop.eup %2384  ;;  %2291 = vmatpush3.msra.mxu1 %v1393_v6  ;;  %2292 = vmatprep.mubr.msk.f32.mxu1 %vm2494_vm1, %v2493_v8 }
 0xab0   :  { %v1391_v9 = vmul.f32 %v2385_v7, %v2381_v59  ;;  %2300 = vmatprep.subr.mxu1 %v2493_v8 }
 0xab2   :  { %2293 = vmatmul.mubr.msk.f32.vlgmr.msra.gmra.mrb[16].mxu1 %vm172_vm2, %v1391_v9 }
 0xab3   :  { %2301 = vmatpush3.msra.mxu1 %v2656_v49  ;;  %2302 = vmatprep.mubr.msk.f32.mxu1 %vm2494_vm1, %v2493_v8  ;;  %v1615_v49 = vpop.permute.xlu1 %1614 }
 0xab4   :  { %2310 = vmatprep.subr.mxu1 %v2493_v8 }
 0xb81   :  { %v1298_v10 = vpop.f32.mrb[14].mxu1 }
 0xb82   :  { %v2284_v12 = vpop.f32.mrb[15].mxu1  ;;  %2303 = vmatmul.mubr.msk.f32.vlgmr.msra.gmra.mrb[18].mxu1 %vm172_vm2, %v1298_v10 }
 0xb83   :  { %2312 = vmatprep.mubr.msk.f32.mxu1 %vm2494_vm1, %v2493_v8 }
 0xb85   :  { %v1464_v16 = vpop.f32.mrb[16].mxu1 }
 0xb86   :  { %v2294_v17 = vpop.f32.mrb[17].mxu1  ;;  %2298 = vmatmul.mubr.msk.f32.vlgmr.msra.gmra.mrb[16].mxu0 %vm172_vm2, %v1464_v16 }
 0xb87   :  { %2306 = vmatpush3.xpose.msk.msra.mxu0 %vm172_vm2, %v1617_v14  ;;  %2307 = vmatprep.mubr.msk.f32.mxu0 %vm2494_vm1, %v2493_v8 }
 0xb88   :  { %2315 = vmatprep.subr.mxu0 %v2493_v8 }
 0xb8a   :  { %2308 = vmatmul.mubr.msk.f32.vlgmr.msra.gmra.mrb[18].mxu0 %vm172_vm2, %v1615_v49 }
 0xb8b   :  { %2316 = vmatpush3.msra.mxu0 %v2694_v15  ;;  %2317 = vmatprep.mubr.msk.f32.mxu0 %vm2494_vm1, %v2493_v8 }
 0xb8c   :  { %2325 = vmatprep.subr.mxu0 %v2493_v8 }
 0xc55   :  { %v1610_v18 = vpop.f32.mrb[18].mxu1 }
 0xc56   :  { %v2304_v19 = vpop.f32.mrb[19].mxu1 }
 0xc59   :  { %v1537_v20 = vpop.f32.mrb[16].mxu0 }
 0xc5a   :  { %v1611_v22 = vadd.f32 %v1610_v18, %v1537_v20  ;;  %v2299_v23 = vpop.f32.mrb[17].mxu0 }
 0xc5d   :  { %v1688_v24 = vpop.f32.mrb[18].mxu0 }
 0xc5e   :  { %v1692_v25 = vsel %vm2624_vm3, %v1688_v24, -1e+30  ;;  %v2309_v26 = vpop.f32.mrb[19].mxu0 }
 0xc5f   :  { %v1693_v27 = vsel %vm172_vm2, %v1692_v25, -inf }
 0xc60   :  { %1694 = vmax.xlane.f32.xlu0 %v1693_v27 }
 0xc76   :  { %1704 = vrot.lane.b32.xlu0 %v2600_v11, %s2504_s15 }
 0xc7a   :  { %1854 = vrot.lane.b32.xlu0 %v2711_v29, %s2503_s14 }
 0xced   :  { %v1695_v15 = vpop.xlane.xlu0 %1694 }
 0xcee   :  { %v1696_v28 = vsub.f32 %v1692_v25, %v1695_v15 }
 0xcf0   :  { %v1697_v13 = vmul.f32 1.442695, %v1696_v28 }
 0xcf1   :  { %v1705_v30 = vpop.permute.xlu0 %1704 }
 0xcf2   :  { %2386 = vpow2.f32 %v1697_v13  ;;  %2311 = vmatpush3.msra.mxu1 %v1705_v30 }
 0xcf3   :  { %2320 = vmatprep.subr.mxu1 %v2493_v8 }
 0xcf5   :  { %v1855_v36 = vpop.permute.xlu0 %1854 }
 0xcfc   :  { %v2387_v31 = vpop.eup %2386 }
 0xcfd   :  { %v1699_v32 = vsel %vm172_vm2, %v2387_v31, 0.0 }
 0xcfe   :  { %1700 = vadd.xlane.f32.xlu1 %v1699_v32 }
 0xd0f   :  { %1856 = vrot.lane.b32.xlu1 %v2600_v11, %s2502_s13 }
 0xd8b   :  { %v1701_v33 = vpop.xlane.xlu1 %1700 }
 0xd8c   :  { %2388 = vrcp.f32 %v1701_v33 }
 0xd8f   :  { %v1857_v29 = vpop.permute.xlu1 %1856 }
 0xd96   :  { %v2389_v34 = vpop.eup %2388 }
 0xd97   :  { %v1703_v35 = vmul.f32 %v2389_v34, %v2387_v31 }
 0xd99   :  { %2313 = vmatmul.mubr.msk.f32.vlgmr.msra.gmra.mrb[20].mxu1 %vm172_vm2, %v1703_v35 }
 0xd9a   :  { %2321 = vmatpush3.xpose.msk.msra.mxu1 %vm172_vm2, %v1857_v29  ;;  %2322 = vmatprep.mubr.msk.f32.mxu1 %vm2494_vm1, %v2493_v8 }
 0xd9b   :  { %2330 = vmatprep.subr.mxu1 %v2493_v8 }
 0xd9d   :  { %2323 = vmatmul.mubr.msk.f32.vlgmr.msra.gmra.mrb[22].mxu1 %vm172_vm2, %v1855_v36 }
 0xd9e   :  { %2331 = vmatpush3.msra.mxu1 %v2732_v38  ;;  %2332 = vmatprep.mubr.msk.f32.mxu1 %vm2494_vm1, %v2493_v8 }
 0xe6c   :  { %v1776_v37 = vpop.f32.mrb[20].mxu1 }
 0xe6d   :  { %v2314_v39 = vpop.f32.mrb[21].mxu1  ;;  %2318 = vmatmul.mubr.msk.f32.vlgmr.msra.gmra.mrb[20].mxu0 %vm172_vm2, %v1776_v37 }
 0xe6e   :  { %2327 = vmatprep.mubr.msk.f32.mxu0 %vm2494_vm1, %v2493_v8 }
 0xe70   :  { %v1928_v41 = vpop.f32.mrb[22].mxu1 }
 0xe71   :  { %v1932_v42 = vsel %vm2624_vm3, %v1928_v41, -1e+30  ;;  %v2324_v40 = vpop.f32.mrb[23].mxu1 }
 0xe72   :  { %v1933_v43 = vsel %vm172_vm2, %v1932_v42, -inf }
 0xe73   :  { %1934 = vmax.xlane.f32.xlu1 %v1933_v43 }
 0xf00   :  { %v1935_v44 = vpop.xlane.xlu1 %1934 }
 0xf01   :  { %v1936_v38 = vsub.f32 %v1932_v42, %v1935_v44 }
 0xf03   :  { %v1937_v45 = vmul.f32 1.442695, %v1936_v38 }
 0xf05   :  { %2390 = vpow2.f32 %v1937_v45 }
 0xf0f   :  { %v2391_v46 = vpop.eup %2390 }
 0xf10   :  { %v1939_v47 = vsel %vm172_vm2, %v2391_v46, 0.0 }
 0xf11   :  { %1940 = vadd.xlane.f32.xlu0 %v1939_v47 }
 0xf27   :  { %1944 = vrot.lane.b32.xlu0 %v2600_v11, %s2505_s16 }
 0xf40   :  { %v1849_v8 = vpop.f32.mrb[20].mxu0 }
 0xf41   :  { %v1853_v48 = vadd.f32 %v1849_v8, %v1611_v22  ;;  %v2319_v50 = vpop.f32.mrb[21].mxu0 }
 0xf9e   :  { %v1941_v21 = vpop.xlane.xlu0 %1940 }
 0xf9f   :  { %2392 = vrcp.f32 %v1941_v21 }
 0xfa2   :  { %v1945_v51 = vpop.permute.xlu0 %1944 }
 0xfa3   :  { %2326 = vmatpush3.msra.mxu0 %v1945_v51 }
 0xfa9   :  { %v2393_v52 = vpop.eup %2392 }
 0xfaa   :  { %v1943_v53 = vmul.f32 %v2393_v52, %v2391_v46 }
 0xfac   :  { %2328 = vmatmul.mubr.msk.f32.vlgmr.msra.gmra.mrb[22].mxu0 %vm172_vm2, %v1943_v53 }
0x107f   :  { %v2016_v54 = vpop.f32.mrb[22].mxu0 }
0x1080   :  { %v2329_v55 = vpop.f32.mrb[23].mxu0  ;;  %2333 = vmatmul.mubr.msk.f32.vlgmr.msra.gmra.mrb[24].mxu1 %vm172_vm2, %v2016_v54 }
0x1153   :  { %v2089_v56 = vpop.f32.mrb[24].mxu1 }
0x1154   :  { %v2093_v57 = vadd.f32 %v2089_v56, %v1853_v48  ;;  %v2334_v11 = vpop.f32.mrb[25].mxu1 }
0x1156   :  { %v2094_v58 = vadd.f32 %v2759_v61, %v2093_v57 }
0x1158   :  { %2095 = vst.msk [vmem:[#allocation8 + $0x8] sm:$0xff] %vm75_vm0, %v2094_v58 }
0x1159   :  { %2471 = shalt.err (!%p2468_p0)
}
0x115a   :  { %s2472_s23 = scalar_lea.hbm %s2838_s5, 256 }
0x115b   :  { %p2473_p1 = scmp.ne.s32.totalorder %s2838_s5, %s2472_s23  ;;  %p2476_p2 = scmp.lt.u32.totalorder %s2472_s23, %s2838_s5 }
0x115d   :  { %p2478_p3 = pnand %p2476_p2, %p2473_p1 }
0x115f   :  { %2481 = shalt.err (!%p2478_p3)
}
0x1160   :  { %2107 = dma.vmem_to_hbm [thread:$0]  %s2102_s18, 256, %s2838_s5, [#allocation4], %s2490_s30, %s2490_s30, %s2491_s6  }
0x1161   :  { %2486 = dma.done.wait [#allocation4], 256  }
0x1162   :  { %2487 = vsyncadd [#allocation4], 4294967040 }
0x1163   :  { %2111 = vsyncpa [#allocation3], 1 }
0x1164   :  { %2112 = vsyncpa [#allocation6], 1 }
0x1165   :  { %2113 = vsyncpa [#allocation4], 1 }

</bundles_post_ra>
